<compile_context>
chip_gen: v7x
topology: tpu7x:2x2x1
jax: 0.10.0
libtpu: 0.0.40
codegen_flags: <defaults>
</compile_context>

<pallas_src>
import functools

import jax
import jax.numpy as jnp
from jax.experimental import pallas as pl
from jax.experimental.pallas import tpu as pltpu


def _round_up(x, m):
    return ((x + m - 1) // m) * m


def _cdiv(a, b):
    return (a + b - 1) // b


def _choose_batch_tiling(B, block_b):
    """Pick (BP, TB): padded batch rows and batch tile.

    TB divides BP, both are multiples of 8.  Avoids padding B beyond the next
    multiple of 8 whenever a reasonably large divisor tile exists (no extra
    HBM copy of x), keeps TB <= 2048 (v7x VMEM headroom), and prefers >= 2
    grid steps so the "parallel" axis can shard across v7x's 2 TensorCores.
    """
    cap = max(8, (min(block_b, 2048) // 8) * 8)
    BP8 = _round_up(B, 8)

    # Small batch: one tile, or two equal tiles when cleanly splittable.
    if BP8 <= cap:
        n8 = BP8 // 8
        if n8 % 2 == 0 and BP8 >= 16:
            return BP8, BP8 // 2
        return BP8, BP8

    # Large batch: largest divisor tile <= cap (zero extra batch padding).
    n8 = BP8 // 8
    best = 0
    d = 1
    while d * d <= n8:
        if n8 % d == 0:
            for dd in (d, n8 // d):
                tb = dd * 8
                if tb <= cap and tb > best:
                    best = tb
        d += 1
    if best >= 256:
        return BP8, best

    # Awkward batch sizes (only tiny divisors): near-cap tile, accept a small
    # (< 8*steps rows) pad instead of degrading DMA efficiency with tiny tiles.
    steps = _cdiv(BP8, cap)
    TB = _round_up(_cdiv(BP8, steps), 8)
    return TB * steps, TB


def mlp_kernel(x_ref, w1_ref, b1_ref, w2_ref, b2_ref, o_ref, *, compute_dtype):
    # Hidden layer: (TB, D) @ (D, HP) with f32 accumulation on the MXU.
    h = jnp.dot(x_ref[...].astype(compute_dtype), w1_ref[...],
                preferred_element_type=jnp.float32)
    # Bias-add + ReLU stay in f32 on the VPU (free under the MXU / DMA).
    h = jnp.maximum(h + b1_ref[...], 0.0)
    # Output layer: (TB, HP) @ (HP, CP) with f32 accumulation.
    out = jnp.dot(h.astype(compute_dtype), w2_ref[...],
                  preferred_element_type=jnp.float32)
    o_ref[...] = (out + b2_ref[...]).astype(o_ref.dtype)


def prepare_params(w1, b1, w2, b2, *, use_bf16=True):
    """One-time parameter prep (hoisted out of the per-call forward path):
    pad hidden/class dims to 128 lanes and cast weights to the compute dtype."""
    D, H = w1.shape
    C = w2.shape[1]
    HP = _round_up(H, 128)
    CP = _round_up(C, 128)
    compute_dtype = jnp.bfloat16 if use_bf16 else jnp.float32
    w1p = jnp.pad(w1, ((0, 0), (0, HP - H))).astype(compute_dtype)
    b1p = jnp.pad(b1.reshape(1, -1), ((0, 0), (0, HP - H))).astype(jnp.float32)
    w2p = jnp.pad(w2, ((0, HP - H), (0, CP - C))).astype(compute_dtype)
    b2p = jnp.pad(b2.reshape(1, -1), ((0, 0), (0, CP - C))).astype(jnp.float32)
    return dict(w1=w1p, b1=b1p, w2=w2p, b2=b2p,
                input_size=D, num_classes=C, compute_dtype=compute_dtype)


def feedforward_forward(x, params, *, block_b=1024, out_dtype=jnp.float32,
                        x_buffer_count=None):
    """x: (B, input_size) f32; params: output of prepare_params().
    Returns (B, num_classes) in out_dtype (f32 by default; bf16 halves
    writeback traffic if downstream tolerates it)."""
    B, D = x.shape
    w1p, b1p, w2p, b2p = params["w1"], params["b1"], params["w2"], params["b2"]
    C = params["num_classes"]
    compute_dtype = params["compute_dtype"]
    assert D == params["input_size"]
    HP = w1p.shape[1]
    CP = w2p.shape[1]

    BP, TB = _choose_batch_tiling(B, block_b)
    # Only pad (and copy) x when strictly necessary; usually BP == B.
    xp = x if BP == B else jnp.pad(x, ((0, BP - B), (0, 0)))

    if x_buffer_count is None:
        x_spec = pl.BlockSpec((TB, D), lambda i: (i, 0))
    else:
        # v7x sweep knob: deeper prefetch on the x stream (e.g. Buffered(3)).
        x_spec = pl.BlockSpec((TB, D), lambda i: (i, 0),
                              pipeline_mode=pl.Buffered(x_buffer_count))

    out_padded = pl.pallas_call(
        functools.partial(mlp_kernel, compute_dtype=compute_dtype),
        out_shape=jax.ShapeDtypeStruct((BP, CP), out_dtype),
        grid=(BP // TB,),
        in_specs=[
            x_spec,                                     # x: tiled over batch
            pl.BlockSpec((D, HP), lambda i: (0, 0)),    # weights: VMEM-resident
            pl.BlockSpec((1, HP), lambda i: (0, 0)),
            pl.BlockSpec((HP, CP), lambda i: (0, 0)),
            pl.BlockSpec((1, CP), lambda i: (0, 0)),
        ],
        out_specs=pl.BlockSpec((TB, CP), lambda i: (i, 0)),
        compiler_params=pltpu.CompilerParams(
            dimension_semantics=("parallel",)),
    )(xp, w1p, b1p, w2p, b2p)

    # Drop batch / class padding outside the kernel.
    return out_padded[:B, :C]


def feedforward_apply(x, w1, b1, w2, b2, *, block_b=1024, use_bf16=True):
    """Convenience one-shot wrapper (prepares params per call)."""
    return feedforward_forward(
        x, prepare_params(w1, b1, w2, b2, use_bf16=use_bf16), block_b=block_b)


if __name__ == "__main__":
    input_size = 784
    hidden = 32
    num_classes = 10
    batch = 10  # not a multiple of 8: exercises the 8-row pad + 2-step grid

    key = jax.random.PRNGKey(0)
    kx, kw1, kb1, kw2, kb2 = jax.random.split(key, 5)

    # Deterministic synthetic inputs/parameters (PyTorch nn.Linear shapes,
    # with linear.weight stored transposed as (in_features, out_features)).
    x = jax.random.normal(kx, (batch, input_size), dtype=jnp.float32)
    w1 = jax.random.normal(kw1, (input_size, hidden), dtype=jnp.float32) * 0.05
    b1 = jax.random.normal(kb1, (1, hidden), dtype=jnp.float32) * 0.05
    w2 = jax.random.normal(kw2, (hidden, num_classes), dtype=jnp.float32) * 0.05
    b2 = jax.random.normal(kb2, (1, num_classes), dtype=jnp.float32) * 0.05

    ref_f32 = jnp.maximum(x @ w1 + b1, 0.0) @ w2 + b2

    # Pure-f32 path: tight check against the plain-JAX reference.
    params_f32 = prepare_params(w1, b1, w2, b2, use_bf16=False)
    out_f32 = jax.block_until_ready(feedforward_forward(x, params_f32))
    assert out_f32.shape == (batch, num_classes)
    assert jnp.allclose(out_f32, ref_f32, atol=1e-4, rtol=1e-4)

    # bf16-MXU fast path: tight check against a bf16-matched reference,
    # loose check against the f32 reference.
    params_bf16 = prepare_params(w1, b1, w2, b2, use_bf16=True)
    out_bf16 = jax.block_until_ready(feedforward_forward(x, params_bf16))
    bf = jnp.bfloat16
    h_ref = jnp.maximum(
        jnp.dot(x.astype(bf), w1.astype(bf),
                preferred_element_type=jnp.float32) + b1, 0.0)
    ref_bf16 = jnp.dot(h_ref.astype(bf), w2.astype(bf),
                       preferred_element_type=jnp.float32) + b2
    assert out_bf16.shape == (batch, num_classes)
    assert jnp.allclose(out_bf16, ref_bf16, atol=2e-3, rtol=2e-3)
    assert jnp.allclose(out_bf16, ref_f32, atol=5e-2, rtol=5e-2)

    print("KERNEL_OK")
</pallas_src>

<mosaic_0001>
module attributes {stable_mosaic.version = 11 : i64} {
  func.func @mlp_kernel(%arg0: i32, %arg1: memref<8x784xf32, #tpu.memory_space<vmem>>, %arg2: memref<784x128xf32, #tpu.memory_space<vmem>>, %arg3: memref<1x128xf32, #tpu.memory_space<vmem>>, %arg4: memref<128x128xf32, #tpu.memory_space<vmem>>, %arg5: memref<1x128xf32, #tpu.memory_space<vmem>>, %arg6: memref<8x128xf32, #tpu.memory_space<vmem>>) attributes {dimension_semantics = [#tpu.dimension_semantics<parallel>], iteration_bounds = array<i64: 2>, scalar_prefetch = 0 : i64, scratch_operands = 0 : i64, tpu.core_type = #tpu.core_type<tc>, window_params = [{transform_indices = @transform_0, window_bounds = array<i64: 8, 784>}, {pipeline_mode = #tpu.pipeline_mode<synchronous>, transform_indices = @transform_1, window_bounds = array<i64: 784, 128>}, {pipeline_mode = #tpu.pipeline_mode<synchronous>, transform_indices = @transform_2, window_bounds = array<i64: 1, 128>}, {pipeline_mode = #tpu.pipeline_mode<synchronous>, transform_indices = @transform_3, window_bounds = array<i64: 128, 128>}, {pipeline_mode = #tpu.pipeline_mode<synchronous>, transform_indices = @transform_4, window_bounds = array<i64: 1, 128>}, {transform_indices = @transform_5, window_bounds = array<i64: 8, 128>}]} {
    %c0 = arith.constant 0 : index
    %c0_0 = arith.constant 0 : index
    %0 = vector.load %arg1[%c0, %c0_0] : memref<8x784xf32, #tpu.memory_space<vmem>>, vector<8x784xf32>
    %c0_1 = arith.constant 0 : index
    %c0_2 = arith.constant 0 : index
    %1 = vector.load %arg2[%c0_1, %c0_2] : memref<784x128xf32, #tpu.memory_space<vmem>>, vector<784x128xf32>
    %cst = arith.constant dense<0.000000e+00> : vector<8x128xf32>
    %2 = tpu.matmul %0, %1, %cst {dimension_numbers = #tpu.dot_dimension_numbers<[1], [0], [0], [1], [0, 0, 1, 1], [], []>} : vector<8x784xf32>, vector<784x128xf32>, vector<8x128xf32> -> vector<8x128xf32>
    %c0_3 = arith.constant 0 : index
    %c0_4 = arith.constant 0 : index
    %3 = vector.load %arg3[%c0_3, %c0_4] : memref<1x128xf32, #tpu.memory_space<vmem>>, vector<1x128xf32>
    %4 = vector.broadcast %3 : vector<1x128xf32> to vector<8x128xf32>
    %5 = arith.addf %2, %4 : vector<8x128xf32>
    %cst_5 = arith.constant 0.000000e+00 : f32
    %6 = vector.broadcast %cst_5 : f32 to vector<8x128xf32>
    %7 = arith.maximumf %5, %6 : vector<8x128xf32>
    %c0_6 = arith.constant 0 : index
    %c0_7 = arith.constant 0 : index
    %8 = vector.load %arg4[%c0_6, %c0_7] : memref<128x128xf32, #tpu.memory_space<vmem>>, vector<128x128xf32>
    %cst_8 = arith.constant dense<0.000000e+00> : vector<8x128xf32>
    %9 = tpu.matmul %7, %8, %cst_8 {dimension_numbers = #tpu.dot_dimension_numbers<[1], [0], [0], [1], [0, 0, 1, 1], [], []>} : vector<8x128xf32>, vector<128x128xf32>, vector<8x128xf32> -> vector<8x128xf32>
    %c0_9 = arith.constant 0 : index
    %c0_10 = arith.constant 0 : index
    %10 = vector.load %arg5[%c0_9, %c0_10] : memref<1x128xf32, #tpu.memory_space<vmem>>, vector<1x128xf32>
    %11 = vector.broadcast %10 : vector<1x128xf32> to vector<8x128xf32>
    %12 = arith.addf %9, %11 : vector<8x128xf32>
    %c0_11 = arith.constant 0 : index
    %c0_12 = arith.constant 0 : index
    %13 = vector.load %arg6[%c0_11, %c0_12] : memref<8x128xf32, #tpu.memory_space<vmem>>, vector<8x128xf32>
    tpu.vector_store %arg6[%c0_11, %c0_12], %12 {strides = array<i32>} : memref<8x128xf32, #tpu.memory_space<vmem>>, vector<8x128xf32>,
    return
  }
  func.func @transform_0(%arg0: i32) -> (i32, i32) {
    %c0_i32 = arith.constant 0 : i32
    %c0_i32_0 = arith.constant 0 : i32
    return %arg0, %c0_i32 : i32, i32
  }
  func.func @transform_1(%arg0: i32) -> (i32, i32) {
    %c0_i32 = arith.constant 0 : i32
    %c0_i32_0 = arith.constant 0 : i32
    %c0_i32_1 = arith.constant 0 : i32
    return %c0_i32, %c0_i32_0 : i32, i32
  }
  func.func @transform_2(%arg0: i32) -> (i32, i32) {
    %c0_i32 = arith.constant 0 : i32
    %c0_i32_0 = arith.constant 0 : i32
    %c0_i32_1 = arith.constant 0 : i32
    return %c0_i32, %c0_i32_0 : i32, i32
  }
  func.func @transform_3(%arg0: i32) -> (i32, i32) {
    %c0_i32 = arith.constant 0 : i32
    %c0_i32_0 = arith.constant 0 : i32
    %c0_i32_1 = arith.constant 0 : i32
    return %c0_i32, %c0_i32_0 : i32, i32
  }
  func.func @transform_4(%arg0: i32) -> (i32, i32) {
    %c0_i32 = arith.constant 0 : i32
    %c0_i32_0 = arith.constant 0 : i32
    %c0_i32_1 = arith.constant 0 : i32
    return %c0_i32, %c0_i32_0 : i32, i32
  }
  func.func @transform_5(%arg0: i32) -> (i32, i32) {
    %c0_i32 = arith.constant 0 : i32
    %c0_i32_0 = arith.constant 0 : i32
    return %arg0, %c0_i32 : i32, i32
  }
}

</mosaic_0001>

<bundles_post_ra>
// kernel: tpu_custom_call.1
= control target key start
LH: loop header
LB: loop body
LE: loop exit
PB: predicated region body
PF: predicated region fallthrough
CT: control target
= control target key end

     0   :  { %10 = vsyncpa [#allocation3], 0  ;;  %s1697_s0 = inlined_call_operand.hbm [shape: f32[16,784], index: 0, kind: input, shape index: {}]   ;;  %s1698_s1 = inlined_call_operand.hbm [shape: f32[784,128], index: 1, kind: input, shape index: {}]   ;;  %s1699_s2 = inlined_call_operand.vmem [shape: f32[1,128], index: 2, kind: input, shape index: {}]   ;;  %s1700_s3 = inlined_call_operand.hbm [shape: f32[128,128], index: 3, kind: input, shape index: {}]   ;;  %s1701_s4 = inlined_call_operand.vmem [shape: f32[1,128], index: 4, kind: input, shape index: {}]   ;;  %s1702_s5 = inlined_call_operand.hbm [shape: f32[16,128], index: 5, kind: output, shape index: {}]  }
   0x1   :  { %12 = vsyncpa [#allocation3 + $0x1], 0 }
   0x2   :  { %13 = vsyncpa [#allocation6], 0 }
   0x3   :  { %14 = vsyncpa [#allocation4], 0 }
   0x4   :  { %16 = vsyncpa [#allocation4 + $0x1], 0  ;;  %s1443_s18 = smov 0   ;;  %s1445_s19 = smov 0  }
   0x5   :  { %s1447_s20 = smov 0   ;;  %s1449_s21 = smov 0  }
   0x6 LB: > { %s1464_s22 = sadd.s32 4294967295, %s1402_s21   ;;  %s864_s23 = sadd.s32 4294967294, %s1402_s21   ;;  %s1402_s21 = sphi %s1449_s21, %s1722_s21   ;;  %s1398_s20 = sphi %s1447_s20, %s1721_s20   ;;  %s1394_s19 = sphi %s1445_s19, %s1720_s19   ;;  %s1390_s18 = sphi %s1443_s18, %s1719_s18  }
   0x7   : > { %p42_p0 = scmp.ne.s32.totalorder %s1394_s19, %s1390_s18  ;;  %p1703_p1 = scmp.eq.s32.totalorder %s1464_s22, 0 }
   0x8   : > { %p156_p3 = scmp.eq.s32.totalorder %s864_s23, 1  ;;  %p865_p5 = scmp.ge.s32.totalorder %s1402_s21, 1 }
   0x9   : > { %p1473_p4 = por %p1703_p1, %p42_p0  ;;  %p163_p7 = scmp.lt.s32.totalorder %s1402_s21, 3 }
   0xa   : > { %p1478_p6 = por %p156_p3, %p42_p0  ;;  %s1404_s27 = smov [#allocation5]  }
   0xb   : > { %s1706_s24 = scalar_select %p1473_p4, 1, 0 }
   0xc   : > { %s1707_s25 = scalar_select %p1478_p6, 1, 0 }
   0xd   : > { %p1483_p8 = pnand %p865_p5, %p163_p7  ;;  %s175_s28 = sshll.u32 %s1404_s27, 4  ;;  %s1487_s28 = int_to_ptr.vmem [resolvable:$true] %s175_s28 }
   0xe   : > { %s1405_s30 = smov [#allocation7]   ;;  %s1246_s9 = scalar_lea.hbm %s1698_s1, 12544 }
   0xf   : > { %p1186_p9 = pneg %p1483_p8  ;;  %s191_s6 = sshll.u32 %s1405_s30, 4  ;;  %s1498_s6 = int_to_ptr.vmem [resolvable:$true] %s191_s6 }
  0x10   : > { %p1247_p12 = scmp.ne.s32.totalorder %s1698_s1, %s1246_s9  ;;  %p1253_p5 = scmp.lt.u32.totalorder %s1246_s9, %s1698_s1 }
  0x11   : > { %p1494_p11 = pnand %p1186_p9, %p1703_p1 }
  0x13   : > { %p1248_p13 = pneg %p1494_p11 }
  0x15   : > { %p1249_p0 = pnand %p1248_p13, %p1247_p12 }
  0x17   : > { %p1250_p3 = pneg %p1249_p0 }
  0x19   : > { %p1255_p7 = pnand %p1253_p5, %p1250_p3 }
  0x1b   : > { %1258 = shalt.err (!%p1255_p7)
}
  0x1c   : > { %s1259_s14 = scalar_lea.vmem %s1487_s28, 12544  ;;  %p1267_p2 = scmp.lt.s32.totalorder %s1487_s28, %s1487_s28 }
  0x1d   : > { %p1260_p9 = scmp.ne.s32.totalorder %s1487_s28, %s1259_s14  ;;  %p1268_p12 = scmp.lt.s32.totalorder %s1259_s14, %s1259_s14 }
  0x1f   : > { %p1262_p10 = pnand %p1260_p9, %p1248_p13  ;;  %p1269_p0 = por %p1268_p12, %p1267_p2 }
  0x21   : > { %p1263_p1 = pneg %p1262_p10 }
  0x23   : > { %p1270_p6 = pnand %p1269_p0, %p1263_p1 }
  0x25   : > { %1273 = shalt.err (!%p1270_p6)
}
  0x26   : > { %s1406_s15 = smov 128   ;;  %s1407_s16 = smov 8  }
  0x27   : > { %1189 = dma.hbm_to_vmem [thread:$0]  (!%p1494_p11), %s1698_s1, 12544, %s1487_s28, [#allocation6], %s1406_s15, %s1406_s15, %s1407_s16  }
  0x28   : > { %s1274_s7 = scalar_lea.hbm %s1700_s3, 2048 }
  0x29   : > { %p1275_p2 = scmp.ne.s32.totalorder %s1700_s3, %s1274_s7  ;;  %p1281_p10 = scmp.lt.u32.totalorder %s1274_s7, %s1700_s3 }
  0x2b   : > { %p1277_p1 = pnand %p1275_p2, %p1248_p13 }
  0x2d   : > { %p1278_p6 = pneg %p1277_p1 }
  0x2f   : > { %p1283_p3 = pnand %p1281_p10, %p1278_p6 }
  0x31   : > { %1286 = shalt.err (!%p1283_p3)
}
  0x32   : > { %s1287_s28 = scalar_lea.vmem %s1498_s6, 2048  ;;  %p1295_p12 = scmp.lt.s32.totalorder %s1498_s6, %s1498_s6 }
  0x33   : > { %p1288_p5 = scmp.ne.s32.totalorder %s1498_s6, %s1287_s28  ;;  %p1296_p0 = scmp.lt.s32.totalorder %s1287_s28, %s1287_s28 }
  0x35   : > { %p1290_p7 = pnand %p1288_p5, %p1248_p13  ;;  %p1297_p2 = por %p1296_p0, %p1295_p12 }
  0x37   : > { %p1291_p9 = pneg %p1290_p7 }
  0x39   : > { %p1298_p1 = pnand %p1297_p2, %p1291_p9 }
  0x3b   : > { %1301 = shalt.err (!%p1298_p1)
}
  0x3c   : > { %1192 = dma.hbm_to_vmem [thread:$0]  (!%p1494_p11), %s1700_s3, 2048, %s1498_s6, [#allocation6], %s1406_s15, %s1406_s15, %s1407_s16  }
  0x3d   : > { %s1553_s14 = sadd.s32 1, %s1402_s21   ;;  %s29_s29 = sadd.s32 1, %s1398_s20 }
  0x3e   : > { %s26_s17 = ssub.s32 %s1402_s21, %s1553_s14  ;;  %p36_p13 = scmp.ne.s32.totalorder %s1398_s20, %s1394_s19 }
  0x3f   : > { %p27_p6 = scmp.eq.s32.totalorder %s26_s17, 0  ;;  %p37_p10 = scmp.eq.s32.totalorder %s1402_s21, 0 }
  0x40   : > { %p1710_p3 = scmp.eq.s32.totalorder %s1464_s22, 1  ;;  %p1203_p7 = scmp.lt.s32.totalorder %s1402_s21, 2 }
  0x41   : > { %s1569_s27 = scalar_select %p27_p6, %s1398_s20, %s29_s29  }
  0x42   : > { %p1563_p5 = por %p1710_p3, %p36_p13  ;;  %p38_p9 = por %p37_p10, %p36_p13 }
  0x43   : > { %s208_s30 = sand.u32 1, %s1398_s20   ;;  %s1172_s6 = smul.u32 896, %s1402_s21 }
  0x44   : > { %s1711_s23 = scalar_select %p1563_p5, 1, 0 }
  0x45   : > { %s1171_s7 = smul.u32 56, %s208_s30  ;;  %p1573_p11 = pnand %p1203_p7, %p38_p9 }
  0x46   : > { %s1580_s9 = scalar_lea.hbm %s1697_s0, %s1172_s6  ;;  %s209_s28 = scalar_lea.sflag [#allocation3], %s208_s30 }
  0x47   : > { %s212_s10 = scalar_lea.vmem [#allocation2], %s1171_s7  ;;  %s1302_s12 = scalar_lea.hbm %s1580_s9, 896 }
  0x48   : > { %s220_s11 = sshll.u32 %s212_s10, 4  ;;  %p1303_p12 = scmp.ne.s32.totalorder %s1580_s9, %s1302_s12  ;;  %s1582_s11 = int_to_ptr.vmem [resolvable:$true] %s220_s11 }
  0x49   : > { %p1304_p0 = pneg %p1573_p11  ;;  %s1307_s17 = scalar_lea.hbm %s1697_s0, 1792 }
  0x4a   : > { %p1308_p13 = scmp.lt.u32.totalorder %s1580_s9, %s1697_s0  ;;  %p1309_p6 = scmp.lt.u32.totalorder %s1307_s17, %s1302_s12 }
  0x4b   : > { %p1305_p2 = pnand %p1304_p0, %p1303_p12  ;;  %p1311_p3 = scmp.lt.u32.totalorder %s1302_s12, %s1580_s9 }
  0x4c   : > { %p1310_p10 = por %p1309_p6, %p1308_p13 }
  0x4d   : > { %p1306_p1 = pneg %p1305_p2 }
  0x4e   : > { %p1312_p7 = por %p1311_p3, %p1310_p10 }
  0x50   : > { %p1313_p9 = pnand %p1312_p7, %p1306_p1 }
  0x52   : > { %1316 = shalt.err (!%p1313_p9)
}
  0x53   : > { %s1317_s30 = scalar_lea.vmem %s1582_s11, 896  ;;  %s1408_s7 = smov [#allocation2]  }
  0x54   : > { %p1318_p12 = scmp.ne.s32.totalorder %s1582_s11, %s1317_s30  ;;  %s1322_s8 = sshll.u32 %s1408_s7, 4  ;;  %s1323_s8 = int_to_ptr.vmem [resolvable:$false] %s1322_s8 }
  0x55   : > { %s1324_s10 = scalar_lea.vmem %s1323_s8, 1792  ;;  %p1325_p4 = scmp.lt.s32.totalorder %s1582_s11, %s1323_s8 }
  0x56   : > { %p1320_p2 = pnand %p1318_p12, %p1304_p0  ;;  %p1326_p13 = scmp.lt.s32.totalorder %s1324_s10, %s1317_s30 }
  0x58   : > { %p1321_p5 = pneg %p1320_p2  ;;  %p1327_p6 = por %p1326_p13, %p1325_p4 }
  0x5a   : > { %p1328_p10 = pnand %p1327_p6, %p1321_p5 }
  0x5c   : > { %1331 = shalt.err (!%p1328_p10)
}
  0x5d   : > { %1196 = dma.hbm_to_vmem [thread:$0]  (!%p1573_p11), %s1580_s9, 896, %s1582_s11, %s209_s28  }
  0x5e   : > { %229 = sbr.rel (%p1483_p8) target bundleno = 621 (0x26d), region = 40  ;;  %s1612_s12 = sand.u32 (!%p1483_p8), 1, %s1394_s19  }
  0x5f   : > { %s1173_s13 = smul.u32 (!%p1483_p8), 56, %s1612_s12  ;;  %s232_s29 = scalar_lea.sflag (!%p1483_p8), [#allocation3], %s1612_s12 }
  0x60   : > { %p1713_p4 = scmp.ne.s32.totalorder (!%p1483_p8), %s1706_s24, 0 }
  0x61   : > { %s1616_s17 = scalar_lea.vmem (!%p1483_p8), [#allocation2], %s1173_s13 }
  0x65   : > { %1377 = dma.done.wait (%p1713_p4), %s232_s29, 896  }
  0x66   : > { %1379 = vsyncadd (%p1713_p4), %s232_s29, 4294966400  ;;  %p1714_p5 = scmp.eq.s32.totalorder %s1464_s22, 0 }
  0x68   : > { %1381 = dma.done.wait (%p1714_p5), [#allocation6], 14592   ;;  %p1715_p8 = pmov %p1714_p5 }
  0x69   : > { %v293_v0 = vld [vmem:[#allocation5 + $0x80] sm:$0xff]  ;;  %v294_v1 = vld [vmem:[#allocation5 + $0x88] sm:$0xff]  ;;  %v295_v11 = vld [vmem:[#allocation5 + $0x90] sm:$0xff]  ;;  %vm1410_vm0 = vmmov 0   ;;  %vm382_vm1 = vcmask 130048   ;;  %s873_s15 = sshll.u32 %s1612_s12, 3 }
  0x6a   : > { %1383 = vsyncadd (%p1715_p8), [#allocation6], 4294952704  ;;  %v277_v2 = vld [vmem:[#allocation5] sm:$0xff]  ;;  %v1048_v3 = vpack.c.bf16 %v294_v1, %v293_v0  ;;  %v278_v4 = vld [vmem:[#allocation5 + $0x8] sm:$0xff]  ;;  %s878_s28 = sshll.u32 %s1464_s22, 7  ;;  %s269_s6 = scalar_lea.vmem [#allocation8], %s873_s15 }
  0x6b   : > { %v325_v5 = vld [vmem:[#allocation5 + $0x180] sm:$0xff]  ;;  %v326_v6 = vld [vmem:[#allocation5 + $0x188] sm:$0xff]  ;;  %v1050_v7 = vpack.c.bf16 %v278_v4, %v277_v2  ;;  %v296_v13 = vld [vmem:[#allocation5 + $0x98] sm:$0xff]  ;;  %s775_s16 = sshll.u32 %s269_s6, 4  ;;  %s1653_s8 = scalar_lea.hbm %s1702_s5, %s878_s28  ;;  %s1655_s16 = int_to_ptr.vmem [resolvable:$true] %s775_s16 }
  0x6c   : > { %v1080_v8 = vpack.c.bf16 %v326_v6, %v325_v5  ;;  %v309_v9 = vld [vmem:[#allocation5 + $0x100] sm:$0xff]  ;;  %v310_v10 = vld [vmem:[#allocation5 + $0x108] sm:$0xff]  ;;  %1049 = vmatprep.subr.bf16.mxu0 %v1048_v3  ;;  %v279_v14 = vld [vmem:[#allocation5 + $0x10] sm:$0xff]  ;;  %v1052_v16 = vpack.c.bf16 %v296_v13, %v295_v11  ;;  %s762_s10 = scalar_lea.sflag [#allocation4], %s1612_s12  ;;  %s1332_s13 = scalar_lea.vmem %s1655_s16, 128 }
  0x6d   : > { %v1082_v12 = vpack.c.bf16 %v310_v10, %v309_v9  ;;  %v280_v15 = vld [vmem:[#allocation5 + $0x18] sm:$0xff]  ;;  %1051 = vmatpush3.bf16.msra.mxu0 %v1050_v7  ;;  %v327_v18 = vld [vmem:[#allocation5 + $0x190] sm:$0xff]  ;;  %v297_v23 = vld [vmem:[#allocation5 + $0xa0] sm:$0xff]  ;;  %p1333_p11 = scmp.ne.s32.totalorder %s1655_s16, %s1332_s13  ;;  %p1716_p0 = scmp.ne.s32.totalorder %s1711_s23, 0 }
  0x6e   : > { %1081 = vmatprep.subr.bf16.mxu1 %v1080_v8  ;;  %v1054_v17 = vpack.c.bf16 %v280_v15, %v279_v14  ;;  %v328_v19 = vld [vmem:[#allocation5 + $0x198] sm:$0xff]  ;;  %v311_v20 = vld [vmem:[#allocation5 + $0x110] sm:$0xff]  ;;  %v298_v24 = vld [vmem:[#allocation5 + $0xa8] sm:$0xff]  ;;  %1053 = vmatprep.subr.bf16.mxu0 %v1052_v16  ;;  %s1412_s22 = smov [#allocation8]  }
  0x6f   : > { %1083 = vmatpush3.bf16.msra.mxu1 %v1082_v12  ;;  %v1084_v21 = vpack.c.bf16 %v328_v19, %v327_v18  ;;  %v312_v22 = vld [vmem:[#allocation5 + $0x118] sm:$0xff]  ;;  %v1056_v26 = vpack.c.bf16 %v298_v24, %v297_v23  ;;  %v281_v27 = vld [vmem:[#allocation5 + $0x20] sm:$0xff]  ;;  %v282_v28 = vld [vmem:[#allocation5 + $0x28] sm:$0xff]  ;;  %p1334_p1 = pnand %p1333_p11, %p1716_p0  ;;  %s1336_s29 = sshll.u32 %s1412_s22, 4  ;;  %s1337_s29 = int_to_ptr.vmem [resolvable:$false] %s1336_s29 }
  0x70   : > { %v1086_v25 = vpack.c.bf16 %v312_v22, %v311_v20  ;;  %v329_v29 = vld [vmem:[#allocation5 + $0x1a0] sm:$0xff]  ;;  %v330_v30 = vld [vmem:[#allocation5 + $0x1a8] sm:$0xff]  ;;  %v1058_v33 = vpack.c.bf16 %v282_v28, %v281_v27  ;;  %v299_v35 = vld [vmem:[#allocation5 + $0xb0] sm:$0xff]  ;;  %p1339_p7 = scmp.lt.s32.totalorder %s1655_s16, %s1337_s29 }
  0x71   : > { %1085 = vmatprep.subr.bf16.mxu1 %v1084_v21  ;;  %v313_v31 = vld [vmem:[#allocation5 + $0x120] sm:$0xff]  ;;  %v314_v32 = vld [vmem:[#allocation5 + $0x128] sm:$0xff]  ;;  %1055 = vmatpush3.bf16.msra.mxu0 %v1054_v17  ;;  %v1088_v34 = vpack.c.bf16 %v330_v30, %v329_v29  ;;  %v300_v36 = vld [vmem:[#allocation5 + $0xb8] sm:$0xff]  ;;  %p1335_p3 = pneg %p1334_p1 }
  0x72   : > { %v283_v37 = vld [vmem:[#allocation5 + $0x30] sm:$0xff]  ;;  %1057 = vmatprep.subr.bf16.mxu0 %v1056_v26  ;;  %v1090_v38 = vpack.c.bf16 %v314_v32, %v313_v31  ;;  %v1060_v39 = vpack.c.bf16 %v300_v36, %v299_v35  ;;  %v284_v40 = vld [vmem:[#allocation5 + $0x38] sm:$0xff]  ;;  %v301_v46 = vld [vmem:[#allocation5 + $0xc0] sm:$0xff] }
  0x73   : > { %1087 = vmatpush3.bf16.msra.mxu1 %v1086_v25  ;;  %v331_v41 = vld [vmem:[#allocation5 + $0x1b0] sm:$0xff]  ;;  %v332_v42 = vld [vmem:[#allocation5 + $0x1b8] sm:$0xff]  ;;  %v302_v47 = vld [vmem:[#allocation5 + $0xc8] sm:$0xff]  ;;  %v1062_v48 = vpack.c.bf16 %v284_v40, %v283_v37 }
  0x74   : > { %1089 = vmatprep.subr.bf16.mxu1 %v1088_v34  ;;  %v1092_v43 = vpack.c.bf16 %v332_v42, %v331_v41  ;;  %v315_v44 = vld [vmem:[#allocation5 + $0x130] sm:$0xff]  ;;  %v316_v45 = vld [vmem:[#allocation5 + $0x138] sm:$0xff]  ;;  %v333_v49 = vld [vmem:[#allocation5 + $0x1c0] sm:$0xff]  ;;  %v1064_v52 = vpack.c.bf16 %v302_v47, %v301_v46 }
  0x75   : > { %1059 = vmatpush3.bf16.msra.mxu0 %v1058_v33  ;;  %v334_v50 = vld [vmem:[#allocation5 + $0x1c8] sm:$0xff]  ;;  %v1094_v51 = vpack.c.bf16 %v316_v45, %v315_v44  ;;  %v285_v53 = vld [vmem:[#allocation5 + $0x40] sm:$0xff]  ;;  %v303_v58 = vld [vmem:[#allocation5 + $0xd0] sm:$0xff] }
  0x76   : > { %1061 = vmatprep.subr.bf16.mxu0 %v1060_v39  ;;  %v286_v54 = vld [vmem:[#allocation5 + $0x48] sm:$0xff]  ;;  %v317_v55 = vld [vmem:[#allocation5 + $0x140] sm:$0xff]  ;;  %v1096_v56 = vpack.c.bf16 %v334_v50, %v333_v49  ;;  %v304_v59 = vld [vmem:[#allocation5 + $0xd8] sm:$0xff]  ;;  %v1409_v50 = vmov 0.0|0.0  }
  0x77   : > { %1091 = vmatpush3.bf16.msra.mxu1 %v1090_v38  ;;  %v318_v57 = vld [vmem:[#allocation5 + $0x148] sm:$0xff]  ;;  %v335_v60 = vld [vmem:[#allocation5 + $0x1d0] sm:$0xff]  ;;  %v336_v61 = vld [vmem:[#allocation5 + $0x1d8] sm:$0xff]  ;;  %v1066_v62 = vpack.c.bf16 %v286_v54, %v285_v53  ;;  %v1068_v0 = vpack.c.bf16 %v304_v59, %v303_v58 }
  0x78   : > { %1093 = vmatprep.subr.bf16.mxu1 %v1092_v43  ;;  %v1098_v63 = vpack.c.bf16 %v318_v57, %v317_v55  ;;  %v287_v1 = vld [vmem:[#allocation5 + $0x50] sm:$0xff]  ;;  %v288_v2 = vld [vmem:[#allocation5 + $0x58] sm:$0xff]  ;;  %v1100_v4 = vpack.c.bf16 %v336_v61, %v335_v60  ;;  %v305_v6 = vld [vmem:[#allocation5 + $0xe0] sm:$0xff]  ;;  %v1411_v60 = vmov 0.0  }
  0x79   : > { %1063 = vmatpush3.bf16.msra.mxu0 %v1062_v48  ;;  %v319_v3 = vld [vmem:[#allocation5 + $0x150] sm:$0xff]  ;;  %v320_v5 = vld [vmem:[#allocation5 + $0x158] sm:$0xff]  ;;  %v306_v7 = vld [vmem:[#allocation5 + $0xe8] sm:$0xff]  ;;  %v1070_v10 = vpack.c.bf16 %v288_v2, %v287_v1 }
  0x7a   : > { %1065 = vmatprep.subr.bf16.mxu0 %v1064_v52  ;;  %v337_v8 = vld [vmem:[#allocation5 + $0x1e0] sm:$0xff]  ;;  %v338_v9 = vld [vmem:[#allocation5 + $0x1e8] sm:$0xff]  ;;  %v271_v12 = vld [vmem:[%s1616_s17 + $0x8] sm:$0xff]  ;;  %v1102_v13 = vpack.c.bf16 %v320_v5, %v319_v3  ;;  %v1072_v14 = vpack.c.bf16 %v306_v7, %v305_v6 }
  0x7b   : > { %1095 = vmatpush3.bf16.msra.mxu1 %v1094_v51  ;;  %v289_v11 = vld [vmem:[#allocation5 + $0x60] sm:$0xff]  ;;  %v290_v15 = vld [vmem:[#allocation5 + $0x68] sm:$0xff]  ;;  %v1104_v18 = vpack.c.bf16 %v338_v9, %v337_v8  ;;  %v307_v19 = vld [vmem:[#allocation5 + $0xf0] sm:$0xff]  ;;  %450 = vmatprep.mubr.f32.mxu0 %v271_v12 }
  0x7c   : > { %1097 = vmatprep.subr.bf16.mxu1 %v1096_v56  ;;  %v321_v16 = vld [vmem:[#allocation5 + $0x160] sm:$0xff]  ;;  %v322_v17 = vld [vmem:[#allocation5 + $0x168] sm:$0xff]  ;;  %v308_v20 = vld [vmem:[#allocation5 + $0xf8] sm:$0xff]  ;;  %v1074_v24 = vpack.c.bf16 %v290_v15, %v289_v11 }
  0x7d   : > { %1067 = vmatpush3.bf16.msra.mxu0 %v1066_v62  ;;  %v273_v21 = vld [vmem:[%s1616_s17 + $0x18] sm:$0xff]  ;;  %v339_v22 = vld [vmem:[#allocation5 + $0x1f0] sm:$0xff]  ;;  %v340_v23 = vld [vmem:[#allocation5 + $0x1f8] sm:$0xff]  ;;  %v1106_v25 = vpack.c.bf16 %v322_v17, %v321_v16  ;;  %v1076_v26 = vpack.c.bf16 %v308_v20, %v307_v19 }
  0x7e   : > { %1069 = vmatprep.subr.bf16.mxu0 %v1068_v0  ;;  %520 = vmatprep.mubr.f32.mxu1 %v273_v21  ;;  %v291_v27 = vld [vmem:[#allocation5 + $0x70] sm:$0xff]  ;;  %v292_v28 = vld [vmem:[#allocation5 + $0x78] sm:$0xff]  ;;  %v1108_v30 = vpack.c.bf16 %v340_v23, %v339_v22  ;;  %v357_v32 = vld [vmem:[#allocation5 + $0x280] sm:$0xff] }
  0x7f   : > { %1099 = vmatpush3.bf16.msra.mxu1 %v1098_v63  ;;  %v323_v29 = vld [vmem:[#allocation5 + $0x170] sm:$0xff]  ;;  %v324_v31 = vld [vmem:[#allocation5 + $0x178] sm:$0xff]  ;;  %v358_v33 = vld [vmem:[#allocation5 + $0x288] sm:$0xff]  ;;  %v1078_v34 = vpack.c.bf16 %v292_v28, %v291_v27 }
  0x80   : > { %1101 = vmatprep.subr.bf16.mxu1 %v1100_v4  ;;  %v1110_v35 = vpack.c.bf16 %v324_v31, %v323_v29  ;;  %v1112_v36 = vpack.c.bf16 %v358_v33, %v357_v32  ;;  %v341_v37 = vld [vmem:[#allocation5 + $0x200] sm:$0xff]  ;;  %v342_v38 = vld [vmem:[#allocation5 + $0x208] sm:$0xff]  ;;  %v359_v39 = vld [vmem:[#allocation5 + $0x290] sm:$0xff] }
  0x81   : > { %1071 = vmatpush3.bf16.msra.mxu0 %v1070_v10  ;;  %v360_v40 = vld [vmem:[#allocation5 + $0x298] sm:$0xff]  ;;  %v270_v41 = vld [vmem:[%s1616_s17] sm:$0xff]  ;;  %v1114_v42 = vpack.c.bf16 %v342_v38, %v341_v37  ;;  %v361_v47 = vld [vmem:[#allocation5 + $0x2a0] sm:$0xff] }
  0x82   : > { %1073 = vmatprep.subr.bf16.mxu0 %v1072_v14  ;;  %v272_v43 = vld [vmem:[%s1616_s17 + $0x10] sm:$0xff]  ;;  %v343_v44 = vld [vmem:[#allocation5 + $0x210] sm:$0xff]  ;;  %v1116_v45 = vpack.c.bf16 %v360_v40, %v359_v39  ;;  %v362_v48 = vld [vmem:[#allocation5 + $0x2a8] sm:$0xff] }
  0x83   : > { %1103 = vmatpush3.bf16.msra.mxu1 %v1102_v13  ;;  %v344_v46 = vld [vmem:[#allocation5 + $0x218] sm:$0xff]  ;;  %v373_v51 = vld [vmem:[#allocation5 + $0x300] sm:$0xff]  ;;  %v374_v52 = vld [vmem:[#allocation5 + $0x308] sm:$0xff]  ;;  %v1120_v55 = vpack.c.bf16 %v362_v48, %v361_v47 }
  0x84   : > { %1105 = vmatprep.subr.bf16.mxu1 %v1104_v18  ;;  %v275_v49 = vld [vmem:[%s1616_s17 + $0x28] sm:$0xff]  ;;  %v1145_v53 = vpack.c.bf16 %v374_v52, %v373_v51  ;;  %v1118_v54 = vpack.c.bf16 %v344_v46, %v343_v44  ;;  %v345_v56 = vld [vmem:[#allocation5 + $0x220] sm:$0xff]  ;;  %v346_v57 = vld [vmem:[#allocation5 + $0x228] sm:$0xff] }
  0x85   : > { %1075 = vmatpush3.bf16.msra.mxu0 %v1074_v24  ;;  %v363_v58 = vld [vmem:[#allocation5 + $0x2b0] sm:$0xff]  ;;  %v364_v59 = vld [vmem:[#allocation5 + $0x2b8] sm:$0xff]  ;;  %v1122_v62 = vpack.c.bf16 %v346_v57, %v345_v56  ;;  %v365_v2 = vld [vmem:[#allocation5 + $0x2c0] sm:$0xff] }
  0x86   : > { %1077 = vmatprep.subr.bf16.mxu0 %v1076_v26  ;;  %v276_v61 = vld [vmem:[%s1616_s17 + $0x30] sm:$0xff]  ;;  %v1124_v63 = vpack.c.bf16 %v364_v59, %v363_v58  ;;  %v347_v0 = vld [vmem:[#allocation5 + $0x230] sm:$0xff]  ;;  %v366_v3 = vld [vmem:[#allocation5 + $0x2c8] sm:$0xff] }
  0x87   : > { %1107 = vmatpush3.bf16.msra.mxu1 %v1106_v25  ;;  %v348_v1 = vld [vmem:[#allocation5 + $0x238] sm:$0xff]  ;;  %v1128_v5 = vpack.c.bf16 %v366_v3, %v365_v2  ;;  %v349_v6 = vld [vmem:[#allocation5 + $0x240] sm:$0xff]  ;;  %v350_v7 = vld [vmem:[#allocation5 + $0x248] sm:$0xff] }
  0x88   : > { %1109 = vmatprep.subr.bf16.mxu1 %v1108_v30  ;;  %v1126_v4 = vpack.c.bf16 %v348_v1, %v347_v0  ;;  %v367_v8 = vld [vmem:[#allocation5 + $0x2d0] sm:$0xff]  ;;  %v368_v9 = vld [vmem:[#allocation5 + $0x2d8] sm:$0xff]  ;;  %v1130_v10 = vpack.c.bf16 %v350_v7, %v349_v6  ;;  %v369_v14 = vld [vmem:[#allocation5 + $0x2e0] sm:$0xff] }
  0x89   : > { %1079 = vmatpush3.bf16.msra.mxu0 %v1078_v34  ;;  %v1132_v11 = vpack.c.bf16 %v368_v9, %v367_v8  ;;  %v351_v12 = vld [vmem:[#allocation5 + $0x250] sm:$0xff]  ;;  %v352_v13 = vld [vmem:[#allocation5 + $0x258] sm:$0xff]  ;;  %v370_v15 = vld [vmem:[#allocation5 + $0x2e8] sm:$0xff] }
  0x8a   : > { %1113 = vmatprep.subr.bf16.mxu0 %v1112_v36  ;;  %v1134_v16 = vpack.c.bf16 %v352_v13, %v351_v12  ;;  %v1136_v17 = vpack.c.bf16 %v370_v15, %v369_v14  ;;  %v353_v18 = vld [vmem:[#allocation5 + $0x260] sm:$0xff]  ;;  %v354_v19 = vld [vmem:[#allocation5 + $0x268] sm:$0xff]  ;;  %v371_v20 = vld [vmem:[#allocation5 + $0x2f0] sm:$0xff] }
  0x8b   : > { %1111 = vmatpush3.bf16.msra.mxu1 %v1110_v35  ;;  %v372_v21 = vld [vmem:[#allocation5 + $0x2f8] sm:$0xff]  ;;  %v1138_v22 = vpack.c.bf16 %v354_v19, %v353_v18  ;;  %v355_v24 = vld [vmem:[#allocation5 + $0x270] sm:$0xff]  ;;  %v669_v30 = vld [vmem:[#allocation7 + $0x10] sm:$0xff] }
  0x8c   : > { %1144 = vmatprep.subr.bf16.mxu1 %v1409_v50  ;;  %451 = vmatmul.mubr.f32.vlgmr.msra.gmra.mrb[0].mxu0 %v270_v41  ;;  %v1140_v23 = vpack.c.bf16 %v372_v21, %v371_v20  ;;  %v356_v25 = vld [vmem:[#allocation5 + $0x278] sm:$0xff]  ;;  %v274_v27 = vld [vmem:[%s1616_s17 + $0x20] sm:$0xff]  ;;  %v673_v37 = vld [vmem:[#allocation7 + $0x30] sm:$0xff]  ;;  %s1338_s17 = scalar_lea.vmem %s1337_s29, 256 }
  0x8d   : > { %1115 = vmatpush3.bf16.msra.mxu0 %v1114_v42  ;;  %590 = vmatprep.mubr.f32.mxu0 %v275_v49  ;;  %v1142_v26 = vpack.c.bf16 %v356_v25, %v355_v24  ;;  %v667_v28 = vld [vmem:[#allocation7] sm:$0xff]  ;;  %v668_v29 = vld [vmem:[#allocation7 + $0x8] sm:$0xff]  ;;  %v670_v32 = vld [vmem:[#allocation7 + $0x18] sm:$0xff]  ;;  %p1340_p9 = scmp.lt.s32.totalorder %s1338_s17, %s1332_s13 }
  0x8e   : > { %521 = vmatmul.mubr.f32.vlgmr.msra.gmra.mrb[0].mxu1 %v272_v43  ;;  %1117 = vmatprep.subr.bf16.mxu0 %v1116_v45  ;;  %v1148_v31 = vpack.c.bf16 %v668_v29, %v667_v28  ;;  %v1151_v33 = vpack.c.bf16 %v670_v32, %v669_v30  ;;  %v671_v34 = vld [vmem:[#allocation7 + $0x20] sm:$0xff]  ;;  %v672_v35 = vld [vmem:[#allocation7 + $0x28] sm:$0xff]  ;;  %v674_v38 = vld [vmem:[#allocation7 + $0x38] sm:$0xff] }
  0x8f   : > { %1146 = vmatpush3.bf16.msra.mxu1 %v1145_v53  ;;  %1010 = vmatprep.mubr.msk.f32.mxu1 %vm1410_vm0, %v1411_v60  ;;  %v1154_v36 = vpack.c.bf16 %v672_v35, %v671_v34  ;;  %v1157_v39 = vpack.c.bf16 %v674_v38, %v673_v37  ;;  %v675_v40 = vld [vmem:[#allocation7 + $0x40] sm:$0xff]  ;;  %v676_v41 = vld [vmem:[#allocation7 + $0x48] sm:$0xff]  ;;  %v677_v43 = vld [vmem:[#allocation7 + $0x50] sm:$0xff]  ;;  %p1341_p12 = por %p1340_p9, %p1339_p7 }
  0x90   : > { %1147 = vmatprep.subr.bf16.mxu1 %v1409_v50  ;;  %v1160_v42 = vpack.c.bf16 %v676_v41, %v675_v40  ;;  %v678_v44 = vld [vmem:[#allocation7 + $0x58] sm:$0xff]  ;;  %v679_v46 = vld [vmem:[#allocation7 + $0x60] sm:$0xff]  ;;  %v680_v47 = vld [vmem:[#allocation7 + $0x68] sm:$0xff] }
  0x91   : > { %1119 = vmatpush3.bf16.msra.mxu0 %v1118_v54  ;;  %v1163_v45 = vpack.c.bf16 %v678_v44, %v677_v43  ;;  %v1166_v48 = vpack.c.bf16 %v680_v47, %v679_v46  ;;  %v681_v49 = vld [vmem:[#allocation7 + $0x70] sm:$0xff]  ;;  %v682_v51 = vld [vmem:[#allocation7 + $0x78] sm:$0xff]  ;;  %v874_v54 = vld [vmem:[%s1699_s2] ss:$0 sm:$0xff]  ;;  %p1342_p2 = pnand %p1341_p12, %p1335_p3 }
  0x92   : > { %1121 = vmatprep.subr.bf16.mxu0 %v1120_v55  ;;  %1011 = vmatmul.mubr.msk.f32.vlgmr.msra.gmra.mrb[2].mxu1 %vm382_vm1, %v276_v61  ;;  %v1169_v52 = vpack.c.bf16 %v682_v51, %v681_v49 }
  0x93   : > { %1045 = vmatprep.mubr.msk.f32.mxu1 %vm1410_vm0, %v1411_v60  ;;  %1149 = vmatpush3.bf16.msra.mxu1 %v1148_v31 }
  0x94   : > { %1150 = vmatprep.subr.bf16.mxu1 %v1409_v50 }
  0x95   : > { %1123 = vmatpush3.bf16.msra.mxu0 %v1122_v62 }
  0x96   : > { %1125 = vmatprep.subr.bf16.mxu0 %v1124_v63 }
  0x97   : > { %1152 = vmatpush3.bf16.msra.mxu1 %v1151_v33 }
  0x98   : > { %1153 = vmatprep.subr.bf16.mxu1 %v1409_v50 }
  0x99   : > { %1127 = vmatpush3.bf16.msra.mxu0 %v1126_v4 }
  0x9a   : > { %1129 = vmatprep.subr.bf16.mxu0 %v1128_v5  ;;  %v876_v5 = vld [vmem:[%s1701_s4] ss:$0 sm:$0xff] }
  0x9b   : > { %1155 = vmatpush3.bf16.msra.mxu1 %v1154_v36 }
  0x9c   : > { %1156 = vmatprep.subr.bf16.mxu1 %v1409_v50 }
  0x9d   : > { %1131 = vmatpush3.bf16.msra.mxu0 %v1130_v10 }
  0x9e   : > { %1133 = vmatprep.subr.bf16.mxu0 %v1132_v11 }
  0x9f   : > { %1158 = vmatpush3.bf16.msra.mxu1 %v1157_v39 }
  0xa0   : > { %1159 = vmatprep.subr.bf16.mxu1 %v1409_v50 }
  0xa1   : > { %1135 = vmatpush3.bf16.msra.mxu0 %v1134_v16 }
  0xa2   : > { %1137 = vmatprep.subr.bf16.mxu0 %v1136_v17 }
  0xa3   : > { %1161 = vmatpush3.bf16.msra.mxu1 %v1160_v42 }
  0xa4   : > { %1162 = vmatprep.subr.bf16.mxu1 %v1409_v50 }
  0xa5   : > { %1139 = vmatpush3.bf16.msra.mxu0 %v1138_v22 }
  0xa6   : > { %1141 = vmatprep.subr.bf16.mxu0 %v1140_v23 }
  0xa7   : > { %1164 = vmatpush3.bf16.msra.mxu1 %v1163_v45 }
  0xa8   : > { %1165 = vmatprep.subr.bf16.mxu1 %v1409_v50 }
  0xa9   : > { %1143 = vmatpush3.bf16.msra.mxu0 %v1142_v26 }
  0xab   : > { %1167 = vmatpush3.bf16.msra.mxu1 %v1166_v48 }
  0xac   : > { %591 = vmatmul.mubr.f32.vlgmr.msra.gmra.mrb[2].mxu0 %v274_v27  ;;  %1168 = vmatprep.subr.bf16.mxu1 %v1409_v50 }
  0xaf   : > { %1170 = vmatpush3.bf16.msra.mxu1 %v1169_v52 }
 0x15f   : > { %v913_v53 = vpop.f32.mrb[0].mxu0 }
 0x160   : > { %v914_v55 = vpop.f32.mrb[1].mxu0 }
 0x161   : > { %v948_v56 = vpop.f32.mrb[0].mxu1  ;;  %v915_v57 = vadd.f32 %v914_v55, %v913_v53 }
 0x162   : > { %v949_v58 = vpop.f32.mrb[1].mxu1 }
 0x163   : > { %v950_v59 = vadd.f32 %v949_v58, %v948_v56  ;;  %v453_v60 = vadd.f32 %v915_v57, %v874_v54 }
 0x165   : > { %v523_v61 = vadd.f32 %v950_v59, %v453_v60  ;;  %v662_v62 = vpop.f32.mrb[2].mxu1 }
 0x166   : > { %v1012_v50 = vpop.f32.mrb[3].mxu1 }
 0x17f   : > { %v983_v63 = vpop.f32.mrb[2].mxu0 }
 0x180   : > { %v984_v0 = vpop.f32.mrb[3].mxu0 }
 0x181   : > { %v985_v1 = vadd.f32 %v984_v0, %v983_v63 }
 0x183   : > { %v593_v2 = vadd.f32 %v985_v1, %v523_v61 }
 0x185   : > { %v663_v3 = vadd.f32 %v662_v62, %v593_v2 }
 0x187   : > { %v666_v4 = vmax.f32 %v663_v3, 0.0 }
 0x189   : > { %1046 = vmatmul.mubr.f32.vlgmr.msra.gmra.mrb[4].mxu1 %v666_v4 }
 0x25c   : > { %v756_v6 = vpop.f32.mrb[4].mxu1 }
 0x25d   : > { %v757_v7 = vadd.f32 %v876_v5, %v756_v6  ;;  %v1047_v8 = vpop.f32.mrb[5].mxu1 }
 0x25f   : > { %760 = vst [vmem:[%s269_s6] sm:$0xff] %v757_v7 }
 0x260   : > { %1345 = shalt.err (!%p1342_p2)
}
 0x261   : > { %s1346_s12 = scalar_lea.hbm %s1653_s8, 128  ;;  %s1350_s15 = scalar_lea.hbm %s1702_s5, 256 }
 0x262   : > { %p1347_p13 = scmp.ne.s32.totalorder %s1653_s8, %s1346_s12  ;;  %p1351_p4 = scmp.lt.u32.totalorder %s1653_s8, %s1702_s5 }
 0x263   : > { %p1352_p5 = scmp.lt.u32.totalorder %s1350_s15, %s1346_s12  ;;  %p1354_p11 = scmp.lt.u32.totalorder %s1346_s12, %s1653_s8 }
 0x264   : > { %p1348_p6 = pnand %p1347_p13, %p1716_p0 }
 0x265   : > { %p1353_p8 = por %p1352_p5, %p1351_p4 }
 0x266   : > { %p1349_p10 = pneg %p1348_p6 }
 0x267   : > { %p1355_p1 = por %p1354_p11, %p1353_p8 }
 0x269   : > { %p1356_p3 = pnand %p1355_p1, %p1349_p10 }
 0x26b   : > { %1359 = shalt.err (!%p1356_p3)
}
 0x26c   : > { %1184 = dma.vmem_to_hbm [thread:$0]  (%p1716_p0), %s1655_s16, 128, %s1653_s8, %s762_s10  }
 0x26d PF: > { %s787_s28 = sand.u32 1, %s1390_s18   ;;  %p1717_p7 = scmp.ne.s32.totalorder %s1707_s25, 0 }
 0x26e   : > { %p1718_p9 = scmp.ge.s32.totalorder %s1402_s21, 2  ;;  %s788_s6 = scalar_lea.sflag [#allocation4], %s787_s28 }
 0x270   : > { %p1198_p12 = pnand %p1718_p9, %p1717_p7 }
 0x272   : > { %1385 = dma.done.wait (!%p1198_p12), %s788_s6, 128  }
 0x273   : > { %1387 = vsyncadd (!%p1198_p12), %s788_s6, 4294967168  ;;  %p19_p2 = scmp.ge.s32.totalorder %s1553_s14, 4   ;;  %s1719_s18 = smov %s1394_s19 }
 0x274   : > { %s1720_s19 = smov %s1398_s20  ;;  %s1721_s20 = smov %s1569_s27 }
 0x275   : > { %s1722_s21 = smov %s1553_s14  ;;  %21 = sbr.rel (!%p19_p2) target bundleno = 6 (0x6), region = 93 }
 0x27c   :  { %793 = vsyncpa [#allocation3], 1 }
 0x27d   :  { %795 = vsyncpa [#allocation3 + $0x1], 1 }
 0x27e   :  { %796 = vsyncpa [#allocation6], 1 }
 0x27f   :  { %797 = vsyncpa [#allocation4], 1 }
 0x280   :  { %799 = vsyncpa [#allocation4 + $0x1], 1 }

</bundles_post_ra>
